<compile_context>
chip_gen: v7x
topology: tpu7x:2x2x1
jax: 0.10.0
libtpu: 0.0.40
codegen_flags: <defaults>
</compile_context>

<pallas_src>
import functools

import jax
import jax.numpy as jnp
import numpy as np
from jax.experimental import pallas as pl
from jax.experimental.pallas import tpu as pltpu


def _vmem_capacity_bytes():
    """Per-core VMEM capacity; conservative 64 MiB (v7x) if the query fails."""
    try:
        info = pltpu.get_tpu_info()
        cap = getattr(info, "vmem_capacity_bytes", None)
        if cap:
            return int(cap)
    except Exception:
        pass
    return 64 * 1024 * 1024


def _kernel(x_ref, w_ref, gamma_ref, beta_ref, o_ref,
            sum_ref, sq_ref, scale_ref, shift_ref, *maybe_y,
            hw, tile_hw, n_hw_tiles, inv_count, eps, needs_mask):
    """grid = (2 phases, N images, n_hw_tiles spatial tiles), all sequential.

    x_ref:     (Cin, tile_hw)  f32    (batch dim squeezed; cast to bf16 in-kernel)
    w_ref:     (Cout, Cin)     f32
    gamma/beta (Cout, 1)       f32
    o_ref:     (Cout, tile_hw) f32
    scratch:   sum/sq/scale/shift (Cout, 1) f32 [+ y (N*T, Cout, tile_hw) f32]
    """
    fused = bool(maybe_y)
    y_scr = maybe_y[0] if fused else None

    phase = pl.program_id(0)
    b = pl.program_id(1)
    t = pl.program_id(2)
    first = jnp.logical_and(b == 0, t == 0)

    def conv_tile():
        # (Cout, Cin) @ (Cin, tile_hw) -> (Cout, tile_hw); bf16 MXU, f32 acc.
        # Casts ride the VPU (free under the MXU-bound dot) -- no wrapper pass.
        xb = x_ref[...].astype(jnp.bfloat16)
        wb = w_ref[...].astype(jnp.bfloat16)
        return jnp.dot(wb, xb, preferred_element_type=jnp.float32)

    @pl.when(phase == 0)
    def _stats_phase():
        @pl.when(first)
        def _init():
            sum_ref[...] = jnp.zeros_like(sum_ref)
            sq_ref[...] = jnp.zeros_like(sq_ref)

        y = conv_tile()
        if needs_mask:
            # Mask the ragged tail columns (past H*W) out of the statistics.
            col = jax.lax.broadcasted_iota(jnp.int32, y.shape, 1) + t * tile_hw
            ym = jnp.where(col < hw, y, 0.0)
        else:
            ym = y
        # Per-channel (sublane) sums: cross-lane reduce rides the XLU slot.
        sum_ref[...] += jnp.sum(ym, axis=1, keepdims=True)
        sq_ref[...] += jnp.sum(ym * ym, axis=1, keepdims=True)
        if fused:
            y_scr[b * n_hw_tiles + t] = y          # keep conv result in VMEM

    @pl.when(phase == 1)
    def _normalize_phase():
        @pl.when(first)
        def _finalize_stats():                      # hoisted: once per call
            mean = sum_ref[...] * inv_count
            var = sq_ref[...] * inv_count - mean * mean
            var = jnp.maximum(var, 0.0)             # cancellation guard
            inv = jax.lax.rsqrt(var + eps)
            scale = gamma_ref[...] * inv
            scale_ref[...] = scale
            shift_ref[...] = beta_ref[...] - mean * scale

        if fused:
            y = y_scr[b * n_hw_tiles + t]
        else:
            y = conv_tile()   # recompute: still cheaper than an HBM round trip
        o_ref[...] = (y * scale_ref[...] + shift_ref[...]).astype(o_ref.dtype)


def _conv1x1_bn(x, w_oi, gamma, beta, *, eps=1e-5, fuse=None,
                full_tile_max=2048, tile_hw_target=512):
    """x: (N, Cin, HW) f32, w_oi: (Cout, Cin), gamma/beta: (Cout,) -> (N, Cout, HW) f32."""
    n, cin, hw = x.shape
    cout = w_oi.shape[0]

    # Spatial (lane) tile: full extent when it fits comfortably (no masking,
    # fewest grid steps), otherwise a lane-dense multiple of 128.
    if hw <= full_tile_max:
        tile_hw = hw
    else:
        tile_hw = max(tile_hw_target - (tile_hw_target % 128), 128)
    n_t = (hw + tile_hw - 1) // tile_hw
    needs_mask = (hw % tile_hw) != 0

    x = x.astype(jnp.float32)
    w_oi = w_oi.astype(jnp.float32)
    gamma2 = gamma.reshape(cout, 1).astype(jnp.float32)
    beta2 = beta.reshape(cout, 1).astype(jnp.float32)

    # --- VMEM budget: keep the conv intermediate resident when it fits. ---
    cap = _vmem_capacity_bytes()
    blk_bytes = 2 * (cin * tile_hw * 4)           # x blocks (f32, double-buffered)
    blk_bytes += 2 * (cout * cin * 4)             # weight
    blk_bytes += 2 * (cout * tile_hw * 4)         # output blocks (f32)
    blk_bytes += 8 * (max(cout, 8) * 128 * 4)     # small per-channel scratches (padded)
    y_bytes = n * n_t * cout * tile_hw * 4        # full conv intermediate (f32)
    if fuse is None:
        fuse = (y_bytes + blk_bytes + (8 << 20)) <= int(0.75 * cap)
    vmem_limit = (y_bytes if fuse else 0) + blk_bytes + (8 << 20)
    vmem_limit = int(min(max(vmem_limit, 32 << 20), int(0.9 * cap)))

    kernel = functools.partial(
        _kernel,
        hw=hw, tile_hw=tile_hw, n_hw_tiles=n_t,
        inv_count=1.0 / float(n * hw), eps=float(eps), needs_mask=needs_mask)

    scratch = [
        pltpu.VMEM((cout, 1), jnp.float32),   # sum
        pltpu.VMEM((cout, 1), jnp.float32),   # sum of squares
        pltpu.VMEM((cout, 1), jnp.float32),   # scale = gamma * rsqrt(var + eps)
        pltpu.VMEM((cout, 1), jnp.float32),   # shift = beta - mean * scale
    ]
    if fuse:
        scratch.append(pltpu.VMEM((n * n_t, cout, tile_hw), jnp.float32))
        # Phase 1 never reads x: park its index on the LAST fetched block so
        # no extra DMA is issued at the phase-0 -> phase-1 transition.
        last_b, last_t = n - 1, n_t - 1
        x_index = lambda p, b, t: (b * (1 - p) + last_b * p, 0,
                                   t * (1 - p) + last_t * p)
    else:
        # Fallback: re-fetch x and recompute the 1x1 conv in phase 1.
        x_index = lambda p, b, t: (b, 0, t)

    out = pl.pallas_call(
        kernel,
        out_shape=jax.ShapeDtypeStruct((n, cout, hw), jnp.float32),
        grid_spec=pltpu.PrefetchScalarGridSpec(
            num_scalar_prefetch=0,
            grid=(2, n, n_t),
            in_specs=[
                pl.BlockSpec((None, cin, tile_hw), x_index),
                pl.BlockSpec((cout, cin), lambda p, b, t: (0, 0)),
                pl.BlockSpec((cout, 1), lambda p, b, t: (0, 0)),
                pl.BlockSpec((cout, 1), lambda p, b, t: (0, 0)),
            ],
            # Phase 0 never writes the output: park its index on block (0,0,0);
            # phase 1 rewrites that block first, so nothing stale reaches HBM.
            out_specs=pl.BlockSpec((None, cout, tile_hw),
                                   lambda p, b, t: (b * p, 0, t * p)),
            scratch_shapes=scratch,
        ),
        compiler_params=pltpu.CompilerParams(
            dimension_semantics=("arbitrary", "arbitrary", "arbitrary"),
            vmem_limit_bytes=vmem_limit,
        ),
    )(x, w_oi, gamma2, beta2)
    return out


def adjust_layer(x_nchw, conv_weight, bn_gamma, bn_beta, *, crop=False, eps=1e-5,
                 fuse=None, full_tile_max=2048):
    """Pallas AdjustLayer forward.

    x_nchw:      (N, Cin, H, W) float32
    conv_weight: (Cout, Cin, 1, 1) float32 (PyTorch Conv2d weight layout)
    bn_gamma:    (Cout,) float32
    bn_beta:     (Cout,) float32
    """
    n, cin, h, w = x_nchw.shape
    cout = conv_weight.shape[0]

    # Collapse spatial dims only — free reshape, no transpose passes over HBM.
    x = x_nchw.reshape(n, cin, h * w)
    w_oi = conv_weight.reshape(cout, cin)

    y = _conv1x1_bn(x, w_oi, bn_gamma, bn_beta, eps=eps, fuse=fuse,
                    full_tile_max=full_tile_max)
    x_ori = y.reshape(n, cout, h, w)

    if not crop:
        return x_ori
    # PyTorch only defines xf when x_ori.size(3) < 20 (otherwise forward raises).
    xf = x_ori[:, :, 4:-4, 4:-4]
    return x_ori, xf


# ---------------------------------------------------------------------------
# Pure-JAX reference (training-mode BatchNorm2d) for verification.  Inputs are
# rounded to bf16 to mirror the kernel's MXU operand precision.
# ---------------------------------------------------------------------------
def _reference(x_nchw, conv_weight, gamma, beta, eps=1e-5):
    n, cin, h, w = x_nchw.shape
    cout = conv_weight.shape[0]
    xb = x_nchw.astype(jnp.bfloat16).astype(jnp.float32)
    wb = conv_weight.reshape(cout, cin).astype(jnp.bfloat16).astype(jnp.float32)
    y = jnp.einsum("nihw,oi->nohw", xb, wb)
    mean = jnp.mean(y, axis=(0, 2, 3), keepdims=True)
    var = jnp.mean((y - mean) ** 2, axis=(0, 2, 3), keepdims=True)
    return (y - mean) / jnp.sqrt(var + eps) * gamma.reshape(1, cout, 1, 1) \
        + beta.reshape(1, cout, 1, 1)


if __name__ == "__main__":
    key = jax.random.PRNGKey(0)
    k_x, k_w, k_g, k_b, k_x2, k_w2, k_x3, k_w3 = jax.random.split(key, 8)

    # --- shape 1: spec-sized demo, exercises the crop branch (W = 16 < 20) ---
    N, C_IN, C_OUT, H, W = 2, 4, 8, 16, 16
    x = jax.random.normal(k_x, (N, C_IN, H, W), dtype=jnp.float32)
    conv_w = jax.random.normal(k_w, (C_OUT, C_IN, 1, 1), dtype=jnp.float32) * 0.1
    gamma = 1.0 + 0.1 * jax.random.normal(k_g, (C_OUT,), dtype=jnp.float32)
    beta = 0.1 * jax.random.normal(k_b, (C_OUT,), dtype=jnp.float32)
    ref = _reference(x, conv_w, gamma, beta)

    # Fused path (conv intermediate resident in VMEM, full-extent lane tile).
    x_ori, xf = adjust_layer(x, conv_w, gamma, beta, crop=True)
    jax.block_until_ready((x_ori, xf))
    np.testing.assert_allclose(np.asarray(x_ori), np.asarray(ref),
                               rtol=1e-3, atol=1e-3)
    np.testing.assert_allclose(np.asarray(xf),
                               np.asarray(ref[:, :, 4:-4, 4:-4]),
                               rtol=1e-3, atol=1e-3)
    assert x_ori.shape == (N, C_OUT, H, W)
    assert xf.shape == (N, C_OUT, H - 8, W - 8)

    # Fallback path (recompute the 1x1 conv in phase 1; no resident intermediate).
    out_nf = adjust_layer(x, conv_w, gamma, beta, crop=False, fuse=False)
    jax.block_until_ready(out_nf)
    np.testing.assert_allclose(np.asarray(out_nf), np.asarray(ref),
                               rtol=1e-3, atol=1e-3)

    # --- shape 2: odd spatial extent (full-extent tile, non-multiple of 128) ---
    N2, C_IN2, C_OUT2, H2, W2 = 1, 16, 16, 23, 23
    x2 = jax.random.normal(k_x2, (N2, C_IN2, H2, W2), dtype=jnp.float32)
    w2 = jax.random.normal(k_w2, (C_OUT2, C_IN2, 1, 1), dtype=jnp.float32) * 0.1
    g2 = jnp.ones((C_OUT2,), jnp.float32)
    b2 = jnp.zeros((C_OUT2,), jnp.float32)
    out2 = adjust_layer(x2, w2, g2, b2, crop=False)
    jax.block_until_ready(out2)
    np.testing.assert_allclose(np.asarray(out2),
                               np.asarray(_reference(x2, w2, g2, b2)),
                               rtol=1e-3, atol=1e-3)

    # --- shape 3: H*W > full_tile_max -> multiple lane tiles + masked tail ---
    N3, C_IN3, C_OUT3, H3, W3 = 1, 8, 16, 48, 48     # H*W = 2304 > 2048
    x3 = jax.random.normal(k_x3, (N3, C_IN3, H3, W3), dtype=jnp.float32)
    w3 = jax.random.normal(k_w3, (C_OUT3, C_IN3, 1, 1), dtype=jnp.float32) * 0.1
    g3 = jnp.ones((C_OUT3,), jnp.float32)
    b3 = jnp.zeros((C_OUT3,), jnp.float32)
    out3 = adjust_layer(x3, w3, g3, b3, crop=False)
    jax.block_until_ready(out3)
    np.testing.assert_allclose(np.asarray(out3),
                               np.asarray(_reference(x3, w3, g3, b3)),
                               rtol=1e-3, atol=1e-3)

    print("KERNEL_OK")
</pallas_src>

<mosaic_0001>
module attributes {stable_mosaic.version = 11 : i64} {
  func.func @_kernel(%arg0: i32, %arg1: i32, %arg2: i32, %arg3: memref<1x4x256xf32, #tpu.memory_space<vmem>>, %arg4: memref<8x4xf32, #tpu.memory_space<vmem>>, %arg5: memref<8x1xf32, #tpu.memory_space<vmem>>, %arg6: memref<8x1xf32, #tpu.memory_space<vmem>>, %arg7: memref<1x8x256xf32, #tpu.memory_space<vmem>>, %arg8: memref<8x1xf32, #tpu.memory_space<vmem>>, %arg9: memref<8x1xf32, #tpu.memory_space<vmem>>, %arg10: memref<8x1xf32, #tpu.memory_space<vmem>>, %arg11: memref<8x1xf32, #tpu.memory_space<vmem>>, %arg12: memref<2x8x256xf32, #tpu.memory_space<vmem>>) attributes {dimension_semantics = [#tpu.dimension_semantics<arbitrary>, #tpu.dimension_semantics<arbitrary>, #tpu.dimension_semantics<arbitrary>], iteration_bounds = array<i64: 2, 2, 1>, scalar_prefetch = 0 : i64, scratch_operands = 5 : i64, tpu.core_type = #tpu.core_type<tc>, window_params = [{transform_indices = @transform_0, window_bounds = array<i64: 1, 4, 256>}, {pipeline_mode = #tpu.pipeline_mode<synchronous>, transform_indices = @transform_1, window_bounds = array<i64: 8, 4>}, {pipeline_mode = #tpu.pipeline_mode<synchronous>, transform_indices = @transform_2, window_bounds = array<i64: 8, 1>}, {pipeline_mode = #tpu.pipeline_mode<synchronous>, transform_indices = @transform_3, window_bounds = array<i64: 8, 1>}, {transform_indices = @transform_4, window_bounds = array<i64: 1, 8, 256>}]} {
    %c0_i32 = arith.constant 0 : i32
    %0 = arith.cmpi eq, %arg1, %c0_i32 : i32
    %c0_i32_0 = arith.constant 0 : i32
    %1 = arith.cmpi eq, %arg2, %c0_i32_0 : i32
    %2 = arith.andi %0, %1 : i1
    %c0_i32_1 = arith.constant 0 : i32
    %3 = arith.cmpi eq, %arg0, %c0_i32_1 : i32
    %4 = arith.extui %3 : i1 to i32
    %c0_i32_2 = arith.constant 0 : i32
    %5 = arith.cmpi ne, %4, %c0_i32_2 : i32
    scf.if %5 {
      %9 = arith.extui %2 : i1 to i32
      %c0_i32_4 = arith.constant 0 : i32
      %10 = arith.cmpi ne, %9, %c0_i32_4 : i32
      scf.if %10 {
        %cst_22 = arith.constant 0.000000e+00 : f32
        %34 = vector.broadcast %cst_22 : f32 to vector<8x1xf32>
        %c0_23 = arith.constant 0 : index
        %c0_24 = arith.constant 0 : index
        %35 = vector.load %arg8[%c0_23, %c0_24] : memref<8x1xf32, #tpu.memory_space<vmem>>, vector<8x1xf32>
        tpu.vector_store %arg8[%c0_23, %c0_24], %34 {strides = array<i32>} : memref<8x1xf32, #tpu.memory_space<vmem>>, vector<8x1xf32>,
        %cst_25 = arith.constant 0.000000e+00 : f32
        %36 = vector.broadcast %cst_25 : f32 to vector<8x1xf32>
        %c0_26 = arith.constant 0 : index
        %c0_27 = arith.constant 0 : index
        %37 = vector.load %arg9[%c0_26, %c0_27] : memref<8x1xf32, #tpu.memory_space<vmem>>, vector<8x1xf32>
        tpu.vector_store %arg9[%c0_26, %c0_27], %36 {strides = array<i32>} : memref<8x1xf32, #tpu.memory_space<vmem>>, vector<8x1xf32>,
      } else {
      }
      %c0 = arith.constant 0 : index
      %c0_5 = arith.constant 0 : index
      %c0_6 = arith.constant 0 : index
      %11 = vector.load %arg3[%c0, %c0_5, %c0_6] : memref<1x4x256xf32, #tpu.memory_space<vmem>>, vector<1x4x256xf32>
      %12 = vector.shape_cast %11 : vector<1x4x256xf32> to vector<4x256xf32>
      %13 = arith.truncf %12 : vector<4x256xf32> to vector<4x256xbf16>
      %c0_7 = arith.constant 0 : index
      %c0_8 = arith.constant 0 : index
      %14 = vector.load %arg4[%c0_7, %c0_8] : memref<8x4xf32, #tpu.memory_space<vmem>>, vector<8x4xf32>
      %15 = arith.truncf %14 : vector<8x4xf32> to vector<8x4xbf16>
      %cst = arith.constant dense<0.000000e+00> : vector<8x256xf32>
      %16 = tpu.matmul %15, %13, %cst {dimension_numbers = #tpu.dot_dimension_numbers<[1], [0], [0], [1], [0, 0, 1, 1], [], []>} : vector<8x4xbf16>, vector<4x256xbf16>, vector<8x256xf32> -> vector<8x256xf32>
      %c0_9 = arith.constant 0 : index
      %c0_10 = arith.constant 0 : index
      %17 = vector.load %arg8[%c0_9, %c0_10] : memref<8x1xf32, #tpu.memory_space<vmem>>, vector<8x1xf32>
      %cst_11 = arith.constant dense<0.000000e+00> : vector<8xf32>
      %18 = vector.multi_reduction <add>, %16, %cst_11 [1] : vector<8x256xf32> to vector<8xf32>
      %19 = vector.shape_cast %18 : vector<8xf32> to vector<8x1xf32>
      %20 = arith.addf %17, %19 : vector<8x1xf32>
      %c0_12 = arith.constant 0 : index
      %c0_13 = arith.constant 0 : index
      %21 = vector.load %arg8[%c0_12, %c0_13] : memref<8x1xf32, #tpu.memory_space<vmem>>, vector<8x1xf32>
      tpu.vector_store %arg8[%c0_12, %c0_13], %20 {strides = array<i32>} : memref<8x1xf32, #tpu.memory_space<vmem>>, vector<8x1xf32>,
      %c0_14 = arith.constant 0 : index
      %c0_15 = arith.constant 0 : index
      %22 = vector.load %arg9[%c0_14, %c0_15] : memref<8x1xf32, #tpu.memory_space<vmem>>, vector<8x1xf32>
      %23 = arith.mulf %16, %16 : vector<8x256xf32>
      %cst_16 = arith.constant dense<0.000000e+00> : vector<8xf32>
      %24 = vector.multi_reduction <add>, %23, %cst_16 [1] : vector<8x256xf32> to vector<8xf32>
      %25 = vector.shape_cast %24 : vector<8xf32> to vector<8x1xf32>
      %26 = arith.addf %22, %25 : vector<8x1xf32>
      %c0_17 = arith.constant 0 : index
      %c0_18 = arith.constant 0 : index
      %27 = vector.load %arg9[%c0_17, %c0_18] : memref<8x1xf32, #tpu.memory_space<vmem>>, vector<8x1xf32>
      tpu.vector_store %arg9[%c0_17, %c0_18], %26 {strides = array<i32>} : memref<8x1xf32, #tpu.memory_space<vmem>>, vector<8x1xf32>,
      %c1_i32_19 = arith.constant 1 : i32
      %28 = arith.muli %arg1, %c1_i32_19 : i32
      %29 = arith.addi %28, %arg2 : i32
      %30 = arith.index_cast %29 : i32 to index
      %c0_20 = arith.constant 0 : index
      %c0_21 = arith.constant 0 : index
      %31 = vector.load %arg12[%30, %c0_20, %c0_21] : memref<2x8x256xf32, #tpu.memory_space<vmem>>, vector<1x8x256xf32>
      %32 = vector.shape_cast %31 : vector<1x8x256xf32> to vector<8x256xf32>
      %33 = vector.shape_cast %16 : vector<8x256xf32> to vector<1x8x256xf32>
      tpu.vector_store %arg12[%30, %c0_20, %c0_21], %33 {strides = array<i32>} : memref<2x8x256xf32, #tpu.memory_space<vmem>>, vector<1x8x256xf32>,
    } else {
    }
    %c1_i32 = arith.constant 1 : i32
    %6 = arith.cmpi eq, %arg0, %c1_i32 : i32
    %7 = arith.extui %6 : i1 to i32
    %c0_i32_3 = arith.constant 0 : i32
    %8 = arith.cmpi ne, %7, %c0_i32_3 : i32
    scf.if %8 {
      %9 = arith.extui %2 : i1 to i32
      %c0_i32_4 = arith.constant 0 : i32
      %10 = arith.cmpi ne, %9, %c0_i32_4 : i32
      scf.if %10 {
        %c0_14 = arith.constant 0 : index
        %c0_15 = arith.constant 0 : index
        %25 = vector.load %arg8[%c0_14, %c0_15] : memref<8x1xf32, #tpu.memory_space<vmem>>, vector<8x1xf32>
        %cst = arith.constant 0.001953125 : f32
        %26 = vector.broadcast %cst : f32 to vector<8x1xf32>
        %27 = arith.mulf %25, %26 : vector<8x1xf32>
        %c0_16 = arith.constant 0 : index
        %c0_17 = arith.constant 0 : index
        %28 = vector.load %arg9[%c0_16, %c0_17] : memref<8x1xf32, #tpu.memory_space<vmem>>, vector<8x1xf32>
        %cst_18 = arith.constant 0.001953125 : f32
        %29 = vector.broadcast %cst_18 : f32 to vector<8x1xf32>
        %30 = arith.mulf %28, %29 : vector<8x1xf32>
        %31 = arith.mulf %27, %27 : vector<8x1xf32>
        %32 = arith.subf %30, %31 : vector<8x1xf32>
        %cst_19 = arith.constant 0.000000e+00 : f32
        %33 = vector.broadcast %cst_19 : f32 to vector<8x1xf32>
        %34 = arith.maximumf %32, %33 : vector<8x1xf32>
        %cst_20 = arith.constant 9.99999974E-6 : f32
        %35 = vector.broadcast %cst_20 : f32 to vector<8x1xf32>
        %36 = arith.addf %34, %35 : vector<8x1xf32>
        %37 = math.rsqrt %36 : vector<8x1xf32>
        %c0_21 = arith.constant 0 : index
        %c0_22 = arith.constant 0 : index
        %38 = vector.load %arg5[%c0_21, %c0_22] : memref<8x1xf32, #tpu.memory_space<vmem>>, vector<8x1xf32>
        %39 = arith.mulf %38, %37 : vector<8x1xf32>
        %c0_23 = arith.constant 0 : index
        %c0_24 = arith.constant 0 : index
        %40 = vector.load %arg10[%c0_23, %c0_24] : memref<8x1xf32, #tpu.memory_space<vmem>>, vector<8x1xf32>
        tpu.vector_store %arg10[%c0_23, %c0_24], %39 {strides = array<i32>} : memref<8x1xf32, #tpu.memory_space<vmem>>, vector<8x1xf32>,
        %c0_25 = arith.constant 0 : index
        %c0_26 = arith.constant 0 : index
        %41 = vector.load %arg6[%c0_25, %c0_26] : memref<8x1xf32, #tpu.memory_space<vmem>>, vector<8x1xf32>
        %42 = arith.mulf %27, %39 : vector<8x1xf32>
        %43 = arith.subf %41, %42 : vector<8x1xf32>
        %c0_27 = arith.constant 0 : index
        %c0_28 = arith.constant 0 : index
        %44 = vector.load %arg11[%c0_27, %c0_28] : memref<8x1xf32, #tpu.memory_space<vmem>>, vector<8x1xf32>
        tpu.vector_store %arg11[%c0_27, %c0_28], %43 {strides = array<i32>} : memref<8x1xf32, #tpu.memory_space<vmem>>, vector<8x1xf32>,
      } else {
      }
      %c1_i32_5 = arith.constant 1 : i32
      %11 = arith.muli %arg1, %c1_i32_5 : i32
      %12 = arith.addi %11, %arg2 : i32
      %13 = arith.index_cast %12 : i32 to index
      %c0 = arith.constant 0 : index
      %c0_6 = arith.constant 0 : index
      %14 = vector.load %arg12[%13, %c0, %c0_6] : memref<2x8x256xf32, #tpu.memory_space<vmem>>, vector<1x8x256xf32>
      %15 = vector.shape_cast %14 : vector<1x8x256xf32> to vector<8x256xf32>
      %c0_7 = arith.constant 0 : index
      %c0_8 = arith.constant 0 : index
      %16 = vector.load %arg10[%c0_7, %c0_8] : memref<8x1xf32, #tpu.memory_space<vmem>>, vector<8x1xf32>
      %17 = vector.broadcast %16 : vector<8x1xf32> to vector<8x256xf32>
      %18 = arith.mulf %15, %17 : vector<8x256xf32>
      %c0_9 = arith.constant 0 : index
      %c0_10 = arith.constant 0 : index
      %19 = vector.load %arg11[%c0_9, %c0_10] : memref<8x1xf32, #tpu.memory_space<vmem>>, vector<8x1xf32>
      %20 = vector.broadcast %19 : vector<8x1xf32> to vector<8x256xf32>
      %21 = arith.addf %18, %20 : vector<8x256xf32>
      %c0_11 = arith.constant 0 : index
      %c0_12 = arith.constant 0 : index
      %c0_13 = arith.constant 0 : index
      %22 = vector.load %arg7[%c0_11, %c0_12, %c0_13] : memref<1x8x256xf32, #tpu.memory_space<vmem>>, vector<1x8x256xf32>
      %23 = vector.shape_cast %22 : vector<1x8x256xf32> to vector<8x256xf32>
      %24 = vector.shape_cast %21 : vector<8x256xf32> to vector<1x8x256xf32>
      tpu.vector_store %arg7[%c0_11, %c0_12, %c0_13], %24 {strides = array<i32>} : memref<1x8x256xf32, #tpu.memory_space<vmem>>, vector<1x8x256xf32>,
    } else {
    }
    return
  }
  func.func @transform_0(%arg0: i32, %arg1: i32, %arg2: i32) -> (i32, i32, i32) {
    %c1_i32 = arith.constant 1 : i32
    %0 = arith.subi %c1_i32, %arg0 : i32
    %1 = arith.muli %arg1, %0 : i32
    %c1_i32_0 = arith.constant 1 : i32
    %2 = arith.muli %c1_i32_0, %arg0 : i32
    %3 = arith.addi %1, %2 : i32
    %c1_i32_1 = arith.constant 1 : i32
    %4 = arith.subi %c1_i32_1, %arg0 : i32
    %5 = arith.muli %arg2, %4 : i32
    %c0_i32 = arith.constant 0 : i32
    %6 = arith.muli %c0_i32, %arg0 : i32
    %7 = arith.addi %5, %6 : i32
    %c0_i32_2 = arith.constant 0 : i32
    %c0_i32_3 = arith.constant 0 : i32
    return %3, %c0_i32_2, %7 : i32, i32, i32
  }
  func.func @transform_1(%arg0: i32, %arg1: i32, %arg2: i32) -> (i32, i32) {
    %c0_i32 = arith.constant 0 : i32
    %c0_i32_0 = arith.constant 0 : i32
    %c0_i32_1 = arith.constant 0 : i32
    return %c0_i32, %c0_i32_0 : i32, i32
  }
  func.func @transform_2(%arg0: i32, %arg1: i32, %arg2: i32) -> (i32, i32) {
    %c0_i32 = arith.constant 0 : i32
    %c0_i32_0 = arith.constant 0 : i32
    %c0_i32_1 = arith.constant 0 : i32
    return %c0_i32, %c0_i32_0 : i32, i32
  }
  func.func @transform_3(%arg0: i32, %arg1: i32, %arg2: i32) -> (i32, i32) {
    %c0_i32 = arith.constant 0 : i32
    %c0_i32_0 = arith.constant 0 : i32
    %c0_i32_1 = arith.constant 0 : i32
    return %c0_i32, %c0_i32_0 : i32, i32
  }
  func.func @transform_4(%arg0: i32, %arg1: i32, %arg2: i32) -> (i32, i32, i32) {
    %0 = arith.muli %arg1, %arg0 : i32
    %1 = arith.muli %arg2, %arg0 : i32
    %c0_i32 = arith.constant 0 : i32
    %c0_i32_0 = arith.constant 0 : i32
    return %0, %c0_i32, %1 : i32, i32, i32
  }
}

</mosaic_0001>

<bundles_post_ra>
// kernel: tpu_custom_call.1
= control target key start
LH: loop header
LB: loop body
LE: loop exit
PB: predicated region body
PF: predicated region fallthrough
CT: control target
= control target key end

     0   :  { %9 = vsyncpa [#allocation8], 0  ;;  %s903_s0 = inlined_call_operand.vmem [shape: f32[2,4,256], index: 0, kind: input, shape index: {}]   ;;  %s904_s1 = inlined_call_operand.vmem [shape: f32[8,4], index: 1, kind: input, shape index: {}]   ;;  %s905_s2 = inlined_call_operand.vmem [shape: f32[8,1], index: 2, kind: input, shape index: {}]   ;;  %s906_s3 = inlined_call_operand.vmem [shape: f32[8,1], index: 3, kind: input, shape index: {}]   ;;  %s907_s4 = inlined_call_operand.hbm [shape: f32[2,8,256], index: 4, kind: output, shape index: {}]  }
   0x1   :  { %11 = vsyncpa [#allocation8 + $0x1], 0  ;;  %s747_s15 = smov 0   ;;  %s749_s16 = smov 0  }
   0x2   :  { %s751_s17 = smov 0   ;;  %s753_s18 = smov 0  }
   0x3   :  { %s755_s19 = smov 0   ;;  %s757_s20 = smov 0  }
   0x4   :  { %s759_s21 = smov 0   ;;  %s761_s22 = smov 0  }
   0x5 LB: > { %s517_s23 = sadd.s32 4294967295, %s716_s22   ;;  %s518_s24 = sadd.s32 4294967294, %s716_s22   ;;  %s716_s22 = sphi %s761_s22, %s17_s22   ;;  %s712_s21 = sphi %s759_s21, %s916_s21   ;;  %s708_s20 = sphi %s757_s20, %s915_s20   ;;  %s704_s19 = sphi %s755_s19, %s914_s19   ;;  %s700_s18 = sphi %s753_s18, %s913_s18   ;;  %s696_s17 = sphi %s751_s17, %s912_s17   ;;  %s692_s16 = sphi %s749_s16, %s911_s16   ;;  %s688_s15 = sphi %s747_s15, %s910_s15  }
   0x6   : > { %s32_s25 = sadd.s32 1, %s708_s20  ;;  %s36_s26 = sadd.s32 1, %s712_s21 }
   0x7   : > { %p34_p0 = scmp.ge.s32.totalorder %s32_s25, 2  ;;  %s139_s27 = smul.u32 %s708_s20, %s712_s21 }
   0x8   : > { %p158_p1 = scmp.ne.s32.totalorder %s696_s17, %s692_s16  ;;  %p159_p2 = scmp.eq.s32.totalorder %s517_s23, 3 }
   0x9   : > { %s918_s25 = smov (%p34_p0, %s32_s25), 0  ;;  %s920_s26 = smov (!%p34_p0, %s36_s26), %s712_s21 }
   0xa   : > { %p164_p3 = scmp.ne.s32.totalorder %s692_s16, %s688_s15  ;;  %p38_p4 = scmp.ge.s32.totalorder %s920_s26, 2 }
   0xb   : > { %p165_p5 = scmp.eq.s32.totalorder %s518_s24, 3  ;;  %p800_p6 = por %p159_p2, %p158_p1 }
   0xc   : > { %p521_p7 = scmp.ge.s32.totalorder %s716_s22, 1  ;;  %s922_s26 = smov (%p38_p4, %s920_s26), 0 }
   0xd   : > { %p807_p8 = por %p165_p5, %p164_p3  ;;  %p213_p9 = scmp.lt.s32.totalorder %s716_s22, 5 }
   0xe   : > { %s141_s30 = smul.u32 %s922_s26, %s918_s25  ;;  %s148_s6 = sadd.s32 1, %s696_s17 }
   0xf   : > { %p214_p10 = pnand %p521_p7, %p213_p9 }
  0x10   : > { %s143_s5 = ssub.s32 %s139_s27, %s141_s30  ;;  %s244_s8 = sand.u32 (!%p214_p10), 1, %s692_s16  }
  0x11   : > { %p146_p11 = scmp.eq.s32.totalorder %s143_s5, 0  ;;  %217 = sbr.rel (%p214_p10) target bundleno = 612 (0x264), region = 36 }
  0x12   : > { %s247_s9 = ssub.s32 (!%p214_p10), 1, %s704_s19  ;;  %s522_s10 = sshll.u32 (!%p214_p10), %s244_s8, 4 }
  0x13   : > { %s816_s7 = scalar_select %p146_p11, %s696_s17, %s148_s6  }
  0x14   : > { %s248_s11 = smul.u32 (!%p214_p10), %s700_s18, %s247_s9  ;;  %p269_p12 = scmp.eq.s32.totalorder (!%p214_p10), %s700_s18, 0 }
  0x15   : > { %s828_s27 = scalar_lea.vmem (!%p214_p10), [#allocation7], %s522_s10  ;;  %p526_p0 = scmp.ne.s32.totalorder (!%p214_p10), %s704_s19, 0 }
  0x16   : > { %s249_s12 = sadd.s32 (!%p214_p10), %s704_s19, %s248_s11 }
  0x17   : > { %p252_p13 = scmp.lt.s32.totalorder (!%p214_p10), %s249_s12, 1 }
  0x18   : > { %276 = sbr.rel (%p526_p0) target bundleno = 411 (0x19b), region = 40 }
  0x19   : > { %s924_s12 = smov (!%p252_p13, %s249_s12), 1 }
  0x1a   : > { %s539_s13 = sshll.u32 %s924_s12, 3 }
  0x1b   : > { %s259_s24 = scalar_lea.vmem %s903_s0, %s539_s13 }
  0x1f   : > { %278 = sbr.rel (!%p269_p12) target bundleno = 38 (0x26), region = 44  ;;  %vm279_vm0 = vcmask (%p269_p12), 7168   ;;  %v718_v0 = vmov (%p269_p12), 0.0  }
  0x20   : > { %280 = vst.msk [vmem:[#allocation2] sm:$0xff] (%p269_p12), %vm279_vm0, %v718_v0  ;;  %281 = vst.msk [vmem:[#allocation3] sm:$0xff] (%p269_p12), %vm279_vm0, %v718_v0 }
  0x26 PF: > { %v282_v1 = vld [vmem:[%s259_s24] sm:$0xff]  ;;  %vm294_vm1 = vcmask 1041408   ;;  %v719_v4 = vmov 0   ;;  %vm290_vm2 = vcmask 31744   ;;  %s541_s6 = sshll.u32 %s700_s18, 4  ;;  %vm347_vm3 = vcmask 7168  }
  0x27   : > { %v284_v2 = vcombine.high %v282_v1, %v282_v1  ;;  %v286_v3 = vpack.c.bf16 %v282_v1, %v282_v1  ;;  %333 = vmatprep.mubr.bf16.mxu0 %v719_v4  ;;  %v288_v5 = vld [vmem:[%s904_s1] sm:$0xff]  ;;  %s360_s9 = scalar_lea.vmem [#allocation6], %s541_s6  ;;  %v349_v20 = vld [vmem:[#allocation3] sm:$0xff] }
  0x28   : > { %v289_v8 = vpack.c.bf16 %v288_v5, %v288_v5  ;;  %v342_v17 = vld [vmem:[#allocation2] sm:$0xff] }
  0x29   : > { %v287_v6 = vpack.c.bf16 %v284_v2, %v284_v2  ;;  %v296_v7 = vsel %vm294_vm1, %v286_v3, 0 }
  0x2b   : > { %527 = vmatprep.subr.msk.bf16.mxu0 %vm294_vm1, %v287_v6 }
  0x2c   : > { %302 = vmatpush1.bf16.msra.mxu0 %v296_v7 }
  0x2f   : > { %528 = vmatmul.mubr.msk.bf16.vlgmr.msra.gmra.mrb[0].mxu0 %vm290_vm2, %v289_v8 }
 0x102   : > { %v335_v9 = vpop.f32.mrb[0].mxu0 }
 0x103   : > { %361 = vst [vmem:[%s360_s9] sm:$0xff] %v335_v9  ;;  %v337_v10 = vpop.f32.mrb[1].mxu0  ;;  %v350_v11 = vmul.f32 %v335_v9, %v335_v9 }
 0x104   : > { %362 = vst [vmem:[%s360_s9 + $0x8] sm:$0xff] %v337_v10  ;;  %v339_v12 = vpop.f32.mrb[2].mxu0  ;;  %v343_v13 = vadd.f32 %v337_v10, %v335_v9  ;;  %v351_v14 = vmul.f32 %v337_v10, %v337_v10 }
 0x105   : > { %v340_v15 = vpop.f32.mrb[3].mxu0 }
 0x106   : > { %344 = vadd.xlane.f32.xlu0 %v343_v13  ;;  %v352_v16 = vadd.f32 %v351_v14, %v350_v11 }
 0x10a   : > { %353 = vadd.xlane.f32.xlu0 %v352_v16 }
 0x193   : > { %v345_v18 = vpop.xlane.xlu0 %344 }
 0x194   : > { %v346_v19 = vadd.f32 %v345_v18, %v342_v17 }
 0x196   : > { %348 = vst.msk [vmem:[#allocation2] sm:$0xff] %vm347_vm3, %v346_v19 }
 0x197   : > { %v354_v21 = vpop.xlane.xlu0 %353 }
 0x198   : > { %v355_v22 = vadd.f32 %v354_v21, %v349_v20 }
 0x19a   : > { %356 = vst.msk [vmem:[#allocation3] sm:$0xff] %vm347_vm3, %v355_v22 }
 0x19b PF: > { %p531_p1 = scmp.ne.s32.totalorder %s704_s19, 1 }
 0x19d   : > { %366 = sbr.rel (%p531_p1) target bundleno = 587 (0x24b), region = 48 }
 0x1a4   : > { %368 = sbr.rel (!%p269_p12) target bundleno = 449 (0x1c1), region = 52  ;;  %v369_v23 = vld [vmem:[#allocation2] sm:$0xff] (%p269_p12)  ;;  %v371_v24 = vld [vmem:[#allocation3] sm:$0xff] (%p269_p12)  ;;  %vm380_vm4 = vcmask (%p269_p12), 7168  }
 0x1a5   : > { %v370_v25 = vmul.f32 (%p269_p12), 0.001953125, %v369_v23  ;;  %v372_v26 = vmul.f32 (%p269_p12), 0.001953125, %v371_v24  ;;  %v378_v31 = vld [vmem:[%s905_s2] sm:$0xff] (%p269_p12) }
 0x1a6   : > { %v382_v34 = vld [vmem:[%s906_s3] sm:$0xff] (%p269_p12) }
 0x1a7   : > { %v373_v27 = vmul.f32 (%p269_p12), %v370_v25, %v370_v25 }
 0x1a9   : > { %v374_v28 = vsub.f32 (%p269_p12), %v372_v26, %v373_v27 }
 0x1ab   : > { %v375_v29 = vmax.f32 %v374_v28, 0.0 }
 0x1ad   : > { %v376_v30 = vadd.f32 1e-05, %v375_v29 }
 0x1af   : > { %619 = vrsqrt.f32 %v376_v30 }
 0x1b9   : > { %v620_v32 = vpop.eup %619 }
 0x1ba   : > { %v379_v33 = vmul.f32 %v620_v32, %v378_v31 }
 0x1bc   : > { %381 = vst.msk [vmem:[#allocation4] sm:$0xff] %vm380_vm4, %v379_v33  ;;  %v383_v35 = vmul.f32 %v379_v33, %v370_v25 }
 0x1be   : > { %v384_v36 = vsub.f32 %v382_v34, %v383_v35 }
 0x1c0   : > { %385 = vst.msk [vmem:[#allocation5] sm:$0xff] %vm380_vm4, %v384_v36 }
 0x1c1 PF: > { %v720_v38 = vmov 0   ;;  %s542_s14 = sshll.u32 %s700_s18, 4 }
 0x1c2   : > { %621 = vset.pattern.permute.xlu0 %v720_v38  ;;  %s389_s23 = scalar_lea.vmem [#allocation6], %s542_s14 }
 0x1c3   : > { %v392_v37 = vld [vmem:[#allocation4] sm:$0xff]  ;;  %v390_v41 = vld [vmem:[%s389_s23] sm:$0xff]  ;;  %v391_v42 = vld [vmem:[%s389_s23 + $0x8] sm:$0xff] }
 0x1c4   : > { %395 = vperm.xlu0 %621, %v392_v37  }
 0x1c7   : > { %v400_v39 = vld [vmem:[#allocation5] sm:$0xff] }
 0x1c8   : > { %403 = vperm.xlu0 %621, %v400_v39  }
 0x243   : > { %v396_v40 = vpop.permute.xlu0 %395 }
 0x244   : > { %v398_v43 = vmul.f32 %v396_v40, %v390_v41  ;;  %v399_v44 = vmul.f32 %v396_v40, %v391_v42 }
 0x247   : > { %v404_v45 = vpop.permute.xlu0 %403 }
 0x248   : > { %v406_v46 = vadd.f32 %v404_v45, %v398_v43  ;;  %v407_v47 = vadd.f32 %v404_v45, %v399_v44 }
 0x24a   : > { %408 = vst [vmem:[%s828_s27] sm:$0xff] %v406_v46  ;;  %409 = vst [vmem:[%s828_s27 + $0x8] sm:$0xff] %v407_v47 }
 0x24b PF: > { %s418_s24 = smul.u32 %s700_s18, %s704_s19  ;;  %s429_s30 = sshll.u32 %s828_s27, 4  ;;  %s852_s30 = int_to_ptr.vmem [resolvable:$true] %s429_s30 }
 0x24c   : > { %s411_s11 = scalar_lea.sflag [#allocation8], %s244_s8  ;;  %s622_s12 = scalar_lea.vmem %s852_s30, 256 }
 0x24d   : > { %s543_s5 = sshll.u32 %s418_s24, 8  ;;  %p623_p2 = scmp.ne.s32.totalorder %s852_s30, %s622_s12 }
 0x24e   : > { %s427_s10 = scalar_lea.hbm %s907_s4, %s543_s5  ;;  %s721_s13 = smov [#allocation7]  }
 0x24f   : > { %p624_p3 = pnand %p623_p2, %p800_p6  ;;  %s626_s18 = sshll.u32 %s721_s13, 4  ;;  %s627_s18 = int_to_ptr.vmem [resolvable:$false] %s626_s18 }
 0x250   : > { %s628_s19 = scalar_lea.vmem %s627_s18, 512  ;;  %p629_p5 = scmp.lt.s32.totalorder %s852_s30, %s627_s18 }
 0x251   : > { %p625_p4 = pneg %p624_p3  ;;  %p630_p7 = scmp.lt.s32.totalorder %s628_s19, %s622_s12 }
 0x253   : > { %p631_p9 = por %p630_p7, %p629_p5 }
 0x255   : > { %p632_p10 = pnand %p631_p9, %p625_p4 }
 0x257   : > { %635 = shalt.err (!%p632_p10)
}
 0x258   : > { %s636_s27 = scalar_lea.hbm %s427_s10, 256  ;;  %s640_s23 = scalar_lea.hbm %s907_s4, 512 }
 0x259   : > { %p637_p11 = scmp.ne.s32.totalorder %s427_s10, %s636_s27  ;;  %p641_p0 = scmp.lt.u32.totalorder %s427_s10, %s907_s4 }
 0x25a   : > { %p642_p1 = scmp.lt.u32.totalorder %s640_s23, %s636_s27  ;;  %p644_p3 = scmp.lt.u32.totalorder %s636_s27, %s427_s10 }
 0x25b   : > { %p638_p12 = pnand %p637_p11, %p800_p6 }
 0x25c   : > { %p643_p2 = por %p642_p1, %p641_p0 }
 0x25d   : > { %p639_p13 = pneg %p638_p12 }
 0x25e   : > { %p645_p5 = por %p644_p3, %p643_p2 }
 0x260   : > { %p646_p4 = pnand %p645_p5, %p639_p13 }
 0x262   : > { %649 = shalt.err (!%p646_p4)
}
 0x263   : > { %544 = dma.vmem_to_hbm [thread:$0]  (%p800_p6), %s852_s30, 256, %s427_s10, %s411_s11  }
 0x264 PF: > { %p550_p7 = scmp.ge.s32.totalorder %s716_s22, 2  ;;  %s441_s6 = sand.u32 1, %s688_s15  }
 0x265   : > { %s442_s9 = scalar_lea.sflag [#allocation8], %s441_s6 }
 0x266   : > { %p547_p9 = pnand %p550_p7, %p807_p8 }
 0x268   : > { %683 = dma.done.wait (!%p547_p9), %s442_s9, 256  }
 0x269   : > { %685 = vsyncadd (!%p547_p9), %s442_s9, 4294967040  ;;  %s17_s22 = sadd.s32 1, %s716_s22   ;;  %s910_s15 = smov %s692_s16 }
 0x26a   : > { %p14_p10 = scmp.ge.s32.totalorder %s17_s22, 6   ;;  %s911_s16 = smov %s696_s17 }
 0x26b   : > { %s912_s17 = smov %s816_s7  ;;  %s913_s18 = smov %s708_s20 }
 0x26c   : > { %s914_s19 = smov %s712_s21  ;;  %s915_s20 = smov %s918_s25 }
 0x26d   : > { %s916_s21 = smov %s922_s26  ;;  %16 = sbr.rel (!%p14_p10) target bundleno = 5 (0x5), region = 89 }
 0x274   :  { %447 = vsyncpa [#allocation8], 1 }
 0x275   :  { %449 = vsyncpa [#allocation8 + $0x1], 1 }

</bundles_post_ra>
